<compile_context>
chip_gen: v6e
topology: v6e:2x2x1
jax: 0.10.0
libtpu: 0.0.40
codegen_flags: <defaults>
</compile_context>

<pallas_src>
import functools

import jax
import jax.numpy as jnp
from jax.experimental import pallas as pl
from jax.experimental.pallas import tpu as pltpu

LANE = 128          # padded feature width for every layer (MXU/lane native)
_W_ROWS = LANE      # each padded weight is (128, 128)
_BIAS_SLAB_ROWS = 8 # one 8-sublane slab holding b1,b2,b3,bo in rows 0..3

# Static row offsets inside the packed parameter blob (all 8-row aligned).
_OFF_W1 = 0
_OFF_W2 = _OFF_W1 + _W_ROWS
_OFF_W3 = _OFF_W2 + _W_ROWS
_OFF_WO = _OFF_W3 + _W_ROWS
_OFF_B = _OFF_WO + _W_ROWS
_BLOB_ROWS = _OFF_B + _BIAS_SLAB_ROWS   # 520


def _round_up(n, m):
    return ((n + m - 1) // m) * m


def mlp_kernel(x_ref, p_ref, o_ref):
    """Fused MLP forward on one batch tile. p_ref is the packed param blob."""
    x = x_ref[...]                                         # (TILE_B, 128)
    w1 = p_ref[_OFF_W1:_OFF_W1 + _W_ROWS, :]
    w2 = p_ref[_OFF_W2:_OFF_W2 + _W_ROWS, :]
    w3 = p_ref[_OFF_W3:_OFF_W3 + _W_ROWS, :]
    wo = p_ref[_OFF_WO:_OFF_WO + _W_ROWS, :]
    b = p_ref[_OFF_B:_OFF_B + _BIAS_SLAB_ROWS, :]          # rows: b1,b2,b3,bo

    h = jnp.maximum(jnp.dot(x, w1, preferred_element_type=jnp.float32) + b[0:1, :], 0.0)
    h = jnp.maximum(jnp.dot(h, w2, preferred_element_type=jnp.float32) + b[1:2, :], 0.0)
    h = jnp.maximum(jnp.dot(h, w3, preferred_element_type=jnp.float32) + b[2:3, :], 0.0)
    out = jnp.dot(h, wo, preferred_element_type=jnp.float32) + b[3:4, :]
    o_ref[...] = out.astype(o_ref.dtype)                   # lane-dense (TILE_B, 128)


def pack_params(params):
    """Zero-pad every weight/bias to 128 lanes and pack into one (520,128) blob.

    Call once at init and reuse the blob for every forward call (single param
    DMA per kernel invocation; padding columns/rows are exact zeros so the
    padded compute matches the unpadded reference bit-for-bit in f32).
    """
    blob = jnp.zeros((_BLOB_ROWS, LANE), jnp.float32)
    names = ["1", "2", "3", "o"]
    offsets = [_OFF_W1, _OFF_W2, _OFF_W3, _OFF_WO]
    for off, name in zip(offsets, names):
        w = params[f"w{name}"]                  # (d_in, d_out)
        din, dout = w.shape
        blob = blob.at[off:off + din, :dout].set(w)
    for i, name in enumerate(names):
        bvec = params[f"b{name}"].reshape(-1)   # (d_out,)
        blob = blob.at[_OFF_B + i, :bvec.shape[0]].set(bvec)
    return blob


@functools.partial(jax.jit, static_argnames=("out_dim", "tile_b"))
def suction_packing_score_predictor(x, packed_params, out_dim, tile_b=256):
    """Forward pass. x: (B, d_in) f32, packed_params: (520, 128) f32 blob."""
    B, d_in = x.shape
    # Batch tile: multiple of 8 (f32 sublane); clamp to the (padded) batch.
    tb = min(_round_up(B, 8), _round_up(tile_b, 8))
    Bp = _round_up(B, tb)

    # Pad batch rows and feature lanes with zeros (exact under the zero-padded
    # weights); done once per call, outside the kernel.
    xp = jnp.zeros((Bp, LANE), jnp.float32).at[:B, :d_in].set(x)

    grid = (pl.cdiv(Bp, tb),)
    flops = 2 * Bp * 4 * LANE * LANE            # 4 padded 128x128 matmuls / row
    bytes_accessed = (xp.size + packed_params.size + Bp * LANE) * 4

    out_padded = pl.pallas_call(
        mlp_kernel,
        out_shape=jax.ShapeDtypeStruct((Bp, LANE), jnp.float32),
        grid_spec=pltpu.PrefetchScalarGridSpec(
            num_scalar_prefetch=0,
            grid=grid,
            in_specs=[
                pl.BlockSpec((tb, LANE), lambda i: (i, 0)),            # x tile
                pl.BlockSpec((_BLOB_ROWS, LANE), lambda i: (0, 0)),    # params stay resident
            ],
            out_specs=pl.BlockSpec((tb, LANE), lambda i: (i, 0)),
        ),
        compiler_params=pltpu.CompilerParams(
            dimension_semantics=("parallel",)),
        cost_estimate=pl.CostEstimate(
            flops=flops, transcendentals=0, bytes_accessed=bytes_accessed),
    )(xp, packed_params)

    # Lane-dense store inside the kernel; slice the real score(s) here.
    return out_padded[:B, :out_dim]


# ------------------------- init / reference (host side) ----------------------

def xavier_uniform(key, fan_in, fan_out):
    # torch.nn.init.xavier_uniform_: U(-a, a), a = sqrt(6 / (fan_in + fan_out))
    limit = jnp.sqrt(6.0 / (fan_in + fan_out))
    return jax.random.uniform(key, (fan_in, fan_out), jnp.float32, -limit, limit)


def init_params(key, model_dict):
    keys = jax.random.split(key, 4)
    dims = [model_dict["1"], model_dict["2"], model_dict["3"], model_dict["output"]]
    names = ["1", "2", "3", "o"]
    params = {}
    for k, (din, dout), name in zip(keys, dims, names):
        params[f"w{name}"] = xavier_uniform(k, din, dout)       # stored (in, out)
        params[f"b{name}"] = jnp.full((1, dout), 0.01, jnp.float32)  # bias fill 0.01
    return params


def reference_forward(x, p):
    h = jnp.maximum(x @ p["w1"] + p["b1"], 0.0)
    h = jnp.maximum(h @ p["w2"] + p["b2"], 0.0)
    h = jnp.maximum(h @ p["w3"] + p["b3"], 0.0)
    return h @ p["wo"] + p["bo"]


if __name__ == "__main__":
    # Mirrors the PyTorch constructor: layer i maps [in_dim, out_dim].
    model_dict = {"1": [32, 64], "2": [64, 64], "3": [64, 32], "output": [32, 1]}

    key = jax.random.PRNGKey(0)
    k_x, k_p = jax.random.split(key)
    batch = 8
    x = jax.random.normal(k_x, (batch, model_dict["1"][0]), jnp.float32)

    params = init_params(k_p, model_dict)
    packed = pack_params(params)   # pack once; reuse for all forward calls

    out = suction_packing_score_predictor(x, packed, out_dim=model_dict["output"][1])
    out = jax.block_until_ready(out)

    ref = reference_forward(x, params)
    assert out.shape == (batch, model_dict["output"][1])
    assert jnp.allclose(out, ref, atol=1e-5, rtol=1e-5)
    print("KERNEL_OK")
</pallas_src>

<mosaic_0001>
module attributes {stable_mosaic.version = 11 : i64} {
  func.func @mlp_kernel(%arg0: i32, %arg1: memref<8x128xf32, #tpu.memory_space<vmem>>, %arg2: memref<520x128xf32, #tpu.memory_space<vmem>>, %arg3: memref<8x128xf32, #tpu.memory_space<vmem>>) attributes {dimension_semantics = [#tpu.dimension_semantics<parallel>], iteration_bounds = array<i64: 1>, scalar_prefetch = 0 : i64, scratch_operands = 0 : i64, tpu.core_type = #tpu.core_type<tc>, window_params = [{transform_indices = @transform_0, window_bounds = array<i64: 8, 128>}, {pipeline_mode = #tpu.pipeline_mode<synchronous>, transform_indices = @transform_1, window_bounds = array<i64: 520, 128>}, {transform_indices = @transform_2, window_bounds = array<i64: 8, 128>}]} {
    %c0 = arith.constant 0 : index
    %c0_0 = arith.constant 0 : index
    %0 = vector.load %arg1[%c0, %c0_0] : memref<8x128xf32, #tpu.memory_space<vmem>>, vector<8x128xf32>
    %c0_1 = arith.constant 0 : index
    %c0_2 = arith.constant 0 : index
    %1 = vector.load %arg2[%c0_1, %c0_2] : memref<520x128xf32, #tpu.memory_space<vmem>>, vector<128x128xf32>
    %c128 = arith.constant 128 : index
    %c0_3 = arith.constant 0 : index
    %2 = vector.load %arg2[%c128, %c0_3] : memref<520x128xf32, #tpu.memory_space<vmem>>, vector<128x128xf32>
    %c256 = arith.constant 256 : index
    %c0_4 = arith.constant 0 : index
    %3 = vector.load %arg2[%c256, %c0_4] : memref<520x128xf32, #tpu.memory_space<vmem>>, vector<128x128xf32>
    %c384 = arith.constant 384 : index
    %c0_5 = arith.constant 0 : index
    %4 = vector.load %arg2[%c384, %c0_5] : memref<520x128xf32, #tpu.memory_space<vmem>>, vector<128x128xf32>
    %c512 = arith.constant 512 : index
    %c0_6 = arith.constant 0 : index
    %5 = vector.load %arg2[%c512, %c0_6] : memref<520x128xf32, #tpu.memory_space<vmem>>, vector<8x128xf32>
    %cst = arith.constant dense<0.000000e+00> : vector<8x128xf32>
    %6 = tpu.matmul %0, %1, %cst {dimension_numbers = #tpu.dot_dimension_numbers<[1], [0], [0], [1], [0, 0, 1, 1], [], []>} : vector<8x128xf32>, vector<128x128xf32>, vector<8x128xf32> -> vector<8x128xf32>
    %7 = vector.extract_strided_slice %5 {offsets = [0, 0], sizes = [1, 128], strides = [1, 1]} : vector<8x128xf32> to vector<1x128xf32>
    %8 = vector.broadcast %7 : vector<1x128xf32> to vector<8x128xf32>
    %9 = arith.addf %6, %8 : vector<8x128xf32>
    %cst_7 = arith.constant 0.000000e+00 : f32
    %10 = vector.broadcast %cst_7 : f32 to vector<8x128xf32>
    %11 = arith.maximumf %9, %10 : vector<8x128xf32>
    %cst_8 = arith.constant dense<0.000000e+00> : vector<8x128xf32>
    %12 = tpu.matmul %11, %2, %cst_8 {dimension_numbers = #tpu.dot_dimension_numbers<[1], [0], [0], [1], [0, 0, 1, 1], [], []>} : vector<8x128xf32>, vector<128x128xf32>, vector<8x128xf32> -> vector<8x128xf32>
    %13 = vector.extract_strided_slice %5 {offsets = [1, 0], sizes = [1, 128], strides = [1, 1]} : vector<8x128xf32> to vector<1x128xf32>
    %14 = vector.broadcast %13 : vector<1x128xf32> to vector<8x128xf32>
    %15 = arith.addf %12, %14 : vector<8x128xf32>
    %cst_9 = arith.constant 0.000000e+00 : f32
    %16 = vector.broadcast %cst_9 : f32 to vector<8x128xf32>
    %17 = arith.maximumf %15, %16 : vector<8x128xf32>
    %cst_10 = arith.constant dense<0.000000e+00> : vector<8x128xf32>
    %18 = tpu.matmul %17, %3, %cst_10 {dimension_numbers = #tpu.dot_dimension_numbers<[1], [0], [0], [1], [0, 0, 1, 1], [], []>} : vector<8x128xf32>, vector<128x128xf32>, vector<8x128xf32> -> vector<8x128xf32>
    %19 = vector.extract_strided_slice %5 {offsets = [2, 0], sizes = [1, 128], strides = [1, 1]} : vector<8x128xf32> to vector<1x128xf32>
    %20 = vector.broadcast %19 : vector<1x128xf32> to vector<8x128xf32>
    %21 = arith.addf %18, %20 : vector<8x128xf32>
    %cst_11 = arith.constant 0.000000e+00 : f32
    %22 = vector.broadcast %cst_11 : f32 to vector<8x128xf32>
    %23 = arith.maximumf %21, %22 : vector<8x128xf32>
    %cst_12 = arith.constant dense<0.000000e+00> : vector<8x128xf32>
    %24 = tpu.matmul %23, %4, %cst_12 {dimension_numbers = #tpu.dot_dimension_numbers<[1], [0], [0], [1], [0, 0, 1, 1], [], []>} : vector<8x128xf32>, vector<128x128xf32>, vector<8x128xf32> -> vector<8x128xf32>
    %25 = vector.extract_strided_slice %5 {offsets = [3, 0], sizes = [1, 128], strides = [1, 1]} : vector<8x128xf32> to vector<1x128xf32>
    %26 = vector.broadcast %25 : vector<1x128xf32> to vector<8x128xf32>
    %27 = arith.addf %24, %26 : vector<8x128xf32>
    %c0_13 = arith.constant 0 : index
    %c0_14 = arith.constant 0 : index
    %28 = vector.load %arg3[%c0_13, %c0_14] : memref<8x128xf32, #tpu.memory_space<vmem>>, vector<8x128xf32>
    tpu.vector_store %arg3[%c0_13, %c0_14], %27 {strides = array<i32>} : memref<8x128xf32, #tpu.memory_space<vmem>>, vector<8x128xf32>,
    return
  }
  func.func @transform_0(%arg0: i32) -> (i32, i32) {
    %c0_i32 = arith.constant 0 : i32
    %c0_i32_0 = arith.constant 0 : i32
    return %arg0, %c0_i32 : i32, i32
  }
  func.func @transform_1(%arg0: i32) -> (i32, i32) {
    %c0_i32 = arith.constant 0 : i32
    %c0_i32_0 = arith.constant 0 : i32
    %c0_i32_1 = arith.constant 0 : i32
    return %c0_i32, %c0_i32_0 : i32, i32
  }
  func.func @transform_2(%arg0: i32) -> (i32, i32) {
    %c0_i32 = arith.constant 0 : i32
    %c0_i32_0 = arith.constant 0 : i32
    return %arg0, %c0_i32 : i32, i32
  }
}

</mosaic_0001>

<bundles_post_ra>
// kernel: suction_packing_score_predictor.1
= control target key start
LH: loop header
LB: loop body
LE: loop exit
PB: predicated region body
PF: predicated region fallthrough
CT: control target
= control target key end

     0   :  { %7 = vsyncpa [#allocation3], 0  ;;  %s631_s9 = smov [#allocation2]   ;;  %s744_s0 = inlined_call_operand.vmem [shape: f32[8,128], index: 0, kind: input, shape index: {}]   ;;  %s745_s1 = inlined_call_operand.hbm [shape: f32[520,128], index: 1, kind: input, shape index: {}]   ;;  %s746_s2 = inlined_call_operand.vmem [shape: f32[8,128], index: 2, kind: output, shape index: {}]  }
   0x1   :  { %s15_s10 = sshll.u32 %s631_s9, 4  ;;  %s16_s10 = int_to_ptr.vmem [resolvable:$true] %s15_s10 }
   0x2   :  { %s617_s11 = scalar_lea.vmem %s16_s10, 8320  ;;  %p622_p1 = scmp.lt.s32.totalorder %s16_s10, %s16_s10 }
   0x3   :  { %p618_p0 = scmp.ne.s32.totalorder %s16_s10, %s617_s11  ;;  %p623_p2 = scmp.lt.s32.totalorder %s617_s11, %s617_s11 }
   0x5   :  { %p624_p3 = por %p623_p2, %p622_p1 }
   0x7   :  { %p625_p4 = pnand %p624_p3, %p618_p0 }
   0x9   :  { %628 = shalt.err (!%p625_p4)
}
   0xa   :  { %s632_s12 = smov 128   ;;  %s633_s13 = smov 8  }
   0xb   :  { %21 = dma.hbm_to_vmem [thread:$0]  %s745_s1, 8320, %s16_s10, [#allocation3], %s632_s12, %s632_s12, %s633_s13  }
   0xc   :  { %629 = dma.done.wait [#allocation3], 8320  }
   0xd   :  { %630 = vsyncadd [#allocation3], 4294958976  ;;  %v634_v0 = vmov 0.0   ;;  %vm635_vm0 = vmmov 0   ;;  %v41_v1 = vld [vmem:[#allocation2 + $0x78] sm:$0xff]  ;;  %v40_v2 = vld [vmem:[#allocation2 + $0x70] sm:$0xff]  ;;  %v91_v47 = vlaneseq }
   0xe   :  { %464 = vmatprep.subr.mxu0 %v634_v0  ;;  %496 = vmatprep.mubr.msk.f32.mxu0 %vm635_vm0, %v634_v0  ;;  %v39_v3 = vld [vmem:[#allocation2 + $0x68] sm:$0xff]  ;;  %v38_v4 = vld [vmem:[#allocation2 + $0x60] sm:$0xff]  ;;  %v57_v5 = vld [vmem:[#allocation2 + $0xf8] sm:$0xff] }
   0xf   :  { %499 = vmatprep.subr.mxu1 %v634_v0  ;;  %531 = vmatprep.mubr.msk.f32.mxu1 %vm635_vm0, %v634_v0  ;;  %v37_v6 = vld [vmem:[#allocation2 + $0x58] sm:$0xff]  ;;  %v56_v7 = vld [vmem:[#allocation2 + $0xf0] sm:$0xff]  ;;  %v55_v8 = vld [vmem:[#allocation2 + $0xe8] sm:$0xff]  ;;  %v710_v48 = vshrl.u32 %v91_v47, 7 }
  0x10   :  { %465 = vmatpush3.msra.mxu0 %v41_v1  ;;  %500 = vmatpush3.msra.mxu1 %v57_v5  ;;  %v36_v9 = vld [vmem:[#allocation2 + $0x50] sm:$0xff]  ;;  %v54_v10 = vld [vmem:[#allocation2 + $0xe0] sm:$0xff]  ;;  %v35_v11 = vld [vmem:[#allocation2 + $0x48] sm:$0xff] }
  0x11   :  { %466 = vmatprep.subr.mxu0 %v634_v0  ;;  %501 = vmatprep.subr.mxu1 %v634_v0  ;;  %v53_v12 = vld [vmem:[#allocation2 + $0xd8] sm:$0xff]  ;;  %v34_v13 = vld [vmem:[#allocation2 + $0x40] sm:$0xff]  ;;  %v52_v14 = vld [vmem:[#allocation2 + $0xd0] sm:$0xff]  ;;  %v93_v49 = vsub.s32 0, %v710_v48 }
  0x12   :  { %467 = vmatpush3.msra.mxu0 %v40_v2  ;;  %502 = vmatpush3.msra.mxu1 %v56_v7  ;;  %v33_v15 = vld [vmem:[#allocation2 + $0x38] sm:$0xff]  ;;  %v51_v16 = vld [vmem:[#allocation2 + $0xc8] sm:$0xff]  ;;  %v32_v17 = vld [vmem:[#allocation2 + $0x30] sm:$0xff] }
  0x13   :  { %468 = vmatprep.subr.mxu0 %v634_v0  ;;  %503 = vmatprep.subr.mxu1 %v634_v0  ;;  %v50_v18 = vld [vmem:[#allocation2 + $0xc0] sm:$0xff]  ;;  %v31_v19 = vld [vmem:[#allocation2 + $0x28] sm:$0xff]  ;;  %v49_v20 = vld [vmem:[#allocation2 + $0xb8] sm:$0xff] }
  0x14   :  { %469 = vmatpush3.msra.mxu0 %v39_v3  ;;  %504 = vmatpush3.msra.mxu1 %v55_v8  ;;  %v30_v21 = vld [vmem:[#allocation2 + $0x20] sm:$0xff]  ;;  %v48_v22 = vld [vmem:[#allocation2 + $0xb0] sm:$0xff]  ;;  %v29_v23 = vld [vmem:[#allocation2 + $0x18] sm:$0xff] }
  0x15   :  { %470 = vmatprep.subr.mxu0 %v634_v0  ;;  %505 = vmatprep.subr.mxu1 %v634_v0  ;;  %v47_v24 = vld [vmem:[#allocation2 + $0xa8] sm:$0xff]  ;;  %v28_v25 = vld [vmem:[#allocation2 + $0x10] sm:$0xff]  ;;  %v46_v26 = vld [vmem:[#allocation2 + $0xa0] sm:$0xff] }
  0x16   :  { %471 = vmatpush3.msra.mxu0 %v38_v4  ;;  %506 = vmatpush3.msra.mxu1 %v54_v10  ;;  %v27_v27 = vld [vmem:[#allocation2 + $0x8] sm:$0xff]  ;;  %v45_v28 = vld [vmem:[#allocation2 + $0x98] sm:$0xff]  ;;  %v26_v29 = vld [vmem:[#allocation2] sm:$0xff] }
  0x17   :  { %472 = vmatprep.subr.mxu0 %v634_v0  ;;  %507 = vmatprep.subr.mxu1 %v634_v0  ;;  %v25_v30 = vld [vmem:[%s744_s0] sm:$0xff]  ;;  %v44_v31 = vld [vmem:[#allocation2 + $0x90] sm:$0xff]  ;;  %v43_v32 = vld [vmem:[#allocation2 + $0x88] sm:$0xff] }
  0x18   :  { %473 = vmatpush3.msra.mxu0 %v37_v6  ;;  %508 = vmatpush3.msra.mxu1 %v53_v12  ;;  %v42_v33 = vld [vmem:[#allocation2 + $0x80] sm:$0xff]  ;;  %v73_v34 = vld [vmem:[#allocation2 + $0x178] sm:$0xff]  ;;  %v72_v35 = vld [vmem:[#allocation2 + $0x170] sm:$0xff] }
  0x19   :  { %474 = vmatprep.subr.mxu0 %v634_v0  ;;  %509 = vmatprep.subr.mxu1 %v634_v0  ;;  %v71_v36 = vld [vmem:[#allocation2 + $0x168] sm:$0xff]  ;;  %v70_v37 = vld [vmem:[#allocation2 + $0x160] sm:$0xff]  ;;  %v69_v38 = vld [vmem:[#allocation2 + $0x158] sm:$0xff] }
  0x1a   :  { %475 = vmatpush3.msra.mxu0 %v36_v9  ;;  %510 = vmatpush3.msra.mxu1 %v52_v14  ;;  %v68_v39 = vld [vmem:[#allocation2 + $0x150] sm:$0xff]  ;;  %v67_v40 = vld [vmem:[#allocation2 + $0x148] sm:$0xff]  ;;  %v66_v41 = vld [vmem:[#allocation2 + $0x140] sm:$0xff]  ;;  %v168_v9 = vsub.s32 1, %v710_v48 }
  0x1b   :  { %476 = vmatprep.subr.mxu0 %v634_v0  ;;  %511 = vmatprep.subr.mxu1 %v634_v0  ;;  %v65_v42 = vld [vmem:[#allocation2 + $0x138] sm:$0xff]  ;;  %v64_v43 = vld [vmem:[#allocation2 + $0x130] sm:$0xff]  ;;  %v63_v44 = vld [vmem:[#allocation2 + $0x128] sm:$0xff] }
  0x1c   :  { %477 = vmatpush3.msra.mxu0 %v35_v11  ;;  %512 = vmatpush3.msra.mxu1 %v51_v16  ;;  %v62_v45 = vld [vmem:[#allocation2 + $0x120] sm:$0xff]  ;;  %v61_v46 = vld [vmem:[#allocation2 + $0x118] sm:$0xff]  ;;  %v60_v56 = vld [vmem:[#allocation2 + $0x110] sm:$0xff] }
  0x1d   :  { %478 = vmatprep.subr.mxu0 %v634_v0  ;;  %513 = vmatprep.subr.mxu1 %v634_v0  ;;  %v713_v50 = vld [vmem:[#allocation2 + $0x200] sm:$0xff]  ;;  %v59_v57 = vld [vmem:[#allocation2 + $0x108] sm:$0xff]  ;;  %v89_v59 = vld [vmem:[#allocation2 + $0x1f8] sm:$0xff] }
  0x1e   :  { %479 = vmatpush3.msra.mxu0 %v34_v13  ;;  %514 = vmatpush3.msra.mxu1 %v50_v18  ;;  %v94_v51 = vrot.slane %v713_v50, %v93_v49  ;;  %v58_v58 = vld [vmem:[#allocation2 + $0x100] sm:$0xff]  ;;  %v88_v60 = vld [vmem:[#allocation2 + $0x1f0] sm:$0xff]  ;;  %v87_v61 = vld [vmem:[#allocation2 + $0x1e8] sm:$0xff]  ;;  %v169_v10 = vrot.slane %v713_v50, %v168_v9  ;;  %v243_v18 = vsub.s32 2, %v710_v48 }
  0x1f   :  { %480 = vmatprep.subr.mxu0 %v634_v0  ;;  %515 = vmatprep.subr.mxu1 %v634_v0  ;;  %v86_v62 = vld [vmem:[#allocation2 + $0x1e0] sm:$0xff]  ;;  %v85_v63 = vld [vmem:[#allocation2 + $0x1d8] sm:$0xff]  ;;  %v84_v1 = vld [vmem:[#allocation2 + $0x1d0] sm:$0xff] }
  0x20   :  { %481 = vmatpush3.msra.mxu0 %v33_v15  ;;  %516 = vmatpush3.msra.mxu1 %v49_v20  ;;  %v83_v2 = vld [vmem:[#allocation2 + $0x1c8] sm:$0xff]  ;;  %v82_v3 = vld [vmem:[#allocation2 + $0x1c0] sm:$0xff]  ;;  %v81_v4 = vld [vmem:[#allocation2 + $0x1b8] sm:$0xff] }
  0x21   :  { %482 = vmatprep.subr.mxu0 %v634_v0  ;;  %517 = vmatprep.subr.mxu1 %v634_v0  ;;  %v80_v5 = vld [vmem:[#allocation2 + $0x1b0] sm:$0xff]  ;;  %v79_v6 = vld [vmem:[#allocation2 + $0x1a8] sm:$0xff]  ;;  %v78_v7 = vld [vmem:[#allocation2 + $0x1a0] sm:$0xff] }
  0x22   :  { %483 = vmatpush3.msra.mxu0 %v32_v17  ;;  %518 = vmatpush3.msra.mxu1 %v48_v22  ;;  %v77_v8 = vld [vmem:[#allocation2 + $0x198] sm:$0xff]  ;;  %v76_v15 = vld [vmem:[#allocation2 + $0x190] sm:$0xff]  ;;  %v75_v16 = vld [vmem:[#allocation2 + $0x188] sm:$0xff] }
  0x23   :  { %484 = vmatprep.subr.mxu0 %v634_v0  ;;  %519 = vmatprep.subr.mxu1 %v634_v0  ;;  %v74_v17 = vld [vmem:[#allocation2 + $0x180] sm:$0xff] }
  0x24   :  { %485 = vmatpush3.msra.mxu0 %v31_v19  ;;  %520 = vmatpush3.msra.mxu1 %v47_v24  ;;  %v244_v19 = vrot.slane %v713_v50, %v243_v18  ;;  %v318_v24 = vsub.s32 3, %v710_v48 }
  0x25   :  { %486 = vmatprep.subr.mxu0 %v634_v0  ;;  %521 = vmatprep.subr.mxu1 %v634_v0 }
  0x26   :  { %487 = vmatpush3.msra.mxu0 %v30_v21  ;;  %522 = vmatpush3.msra.mxu1 %v46_v26 }
  0x27   :  { %488 = vmatprep.subr.mxu0 %v634_v0  ;;  %523 = vmatprep.subr.mxu1 %v634_v0 }
  0x28   :  { %489 = vmatpush3.msra.mxu0 %v29_v23  ;;  %524 = vmatpush3.msra.mxu1 %v45_v28 }
  0x29   :  { %490 = vmatprep.subr.mxu0 %v634_v0  ;;  %525 = vmatprep.subr.mxu1 %v634_v0 }
  0x2a   :  { %491 = vmatpush3.msra.mxu0 %v28_v25  ;;  %526 = vmatpush3.msra.mxu1 %v44_v31  ;;  %v319_v25 = vrot.slane %v713_v50, %v318_v24 }
  0x2b   :  { %492 = vmatprep.subr.mxu0 %v634_v0  ;;  %527 = vmatprep.subr.mxu1 %v634_v0 }
  0x2c   :  { %493 = vmatpush3.msra.mxu0 %v27_v27  ;;  %528 = vmatpush3.msra.mxu1 %v43_v32 }
  0x2d   :  { %494 = vmatprep.subr.mxu0 %v634_v0  ;;  %529 = vmatprep.subr.mxu1 %v634_v0 }
  0x2e   :  { %495 = vmatpush3.msra.mxu0 %v26_v29  ;;  %530 = vmatpush3.msra.mxu1 %v42_v33 }
  0x2f   :  { %497 = vmatmul.mubr.f32.vlgmr.msra.gmra.mxu0 %v25_v30  ;;  %534 = vmatprep.subr.mxu0 %v634_v0 }
  0x30   :  { %566 = vmatprep.mubr.msk.f32.mxu0 %vm635_vm0, %v634_v0  ;;  %569 = vmatprep.subr.mxu1 %v634_v0 }
  0x31   :  { %535 = vmatpush3.msra.mxu0 %v73_v34 }
  0x32   :  { %536 = vmatprep.subr.mxu0 %v634_v0 }
  0x33   :  { %537 = vmatpush3.msra.mxu0 %v72_v35 }
  0x34   :  { %538 = vmatprep.subr.mxu0 %v634_v0 }
  0x35   :  { %539 = vmatpush3.msra.mxu0 %v71_v36 }
  0x36   :  { %540 = vmatprep.subr.mxu0 %v634_v0 }
  0x37   :  { %541 = vmatpush3.msra.mxu0 %v70_v37 }
  0x38   :  { %542 = vmatprep.subr.mxu0 %v634_v0 }
  0x39   :  { %543 = vmatpush3.msra.mxu0 %v69_v38 }
  0x3a   :  { %544 = vmatprep.subr.mxu0 %v634_v0 }
  0x3b   :  { %545 = vmatpush3.msra.mxu0 %v68_v39 }
  0x3c   :  { %546 = vmatprep.subr.mxu0 %v634_v0 }
  0x3d   :  { %547 = vmatpush3.msra.mxu0 %v67_v40 }
  0x3e   :  { %548 = vmatprep.subr.mxu0 %v634_v0 }
  0x3f   :  { %549 = vmatpush3.msra.mxu0 %v66_v41 }
  0x40   :  { %550 = vmatprep.subr.mxu0 %v634_v0 }
  0x41   :  { %551 = vmatpush3.msra.mxu0 %v65_v42 }
  0x42   :  { %552 = vmatprep.subr.mxu0 %v634_v0 }
  0x43   :  { %553 = vmatpush3.msra.mxu0 %v64_v43 }
  0x44   :  { %554 = vmatprep.subr.mxu0 %v634_v0 }
  0x45   :  { %555 = vmatpush3.msra.mxu0 %v63_v44 }
  0x46   :  { %556 = vmatprep.subr.mxu0 %v634_v0 }
  0x47   :  { %557 = vmatpush3.msra.mxu0 %v62_v45 }
  0x48   :  { %558 = vmatprep.subr.mxu0 %v634_v0 }
  0x49   :  { %559 = vmatpush3.msra.mxu0 %v61_v46 }
  0x4a   :  { %560 = vmatprep.subr.mxu0 %v634_v0 }
  0x4b   :  { %561 = vmatpush3.msra.mxu0 %v60_v56 }
  0x4c   :  { %562 = vmatprep.subr.mxu0 %v634_v0 }
  0x4d   :  { %563 = vmatpush3.msra.mxu0 %v59_v57 }
  0x4e   :  { %564 = vmatprep.subr.mxu0 %v634_v0 }
  0x4f   :  { %565 = vmatpush3.msra.mxu0 %v58_v58 }
  0xef   :  { %v161_v52 = vpop.f32.mrf.mxu0 }
  0xf0   :  { %v162_v53 = vadd.f32 %v161_v52, %v94_v51 }
  0xf1   :  { %v498_v54 = vpop.f32.mrf.mxu0 }
  0xf2   :  { %v165_v55 = vmax.f32 %v162_v53, 0.0 }
  0xf4   :  { %532 = vmatmul.mubr.f32.vlgmr.msra.gmra.mxu1 %v165_v55 }
  0xf5   :  { %601 = vmatprep.mubr.msk.f32.mxu1 %vm635_vm0, %v634_v0  ;;  %570 = vmatpush3.msra.mxu1 %v89_v59 }
  0xf6   :  { %571 = vmatprep.subr.mxu1 %v634_v0 }
  0xf7   :  { %572 = vmatpush3.msra.mxu1 %v88_v60 }
  0xf8   :  { %573 = vmatprep.subr.mxu1 %v634_v0 }
  0xf9   :  { %574 = vmatpush3.msra.mxu1 %v87_v61 }
  0xfa   :  { %575 = vmatprep.subr.mxu1 %v634_v0 }
  0xfb   :  { %576 = vmatpush3.msra.mxu1 %v86_v62 }
  0xfc   :  { %577 = vmatprep.subr.mxu1 %v634_v0 }
  0xfd   :  { %578 = vmatpush3.msra.mxu1 %v85_v63 }
  0xfe   :  { %579 = vmatprep.subr.mxu1 %v634_v0 }
  0xff   :  { %580 = vmatpush3.msra.mxu1 %v84_v1 }
 0x100   :  { %581 = vmatprep.subr.mxu1 %v634_v0 }
 0x101   :  { %582 = vmatpush3.msra.mxu1 %v83_v2 }
 0x102   :  { %583 = vmatprep.subr.mxu1 %v634_v0 }
 0x103   :  { %584 = vmatpush3.msra.mxu1 %v82_v3 }
 0x104   :  { %585 = vmatprep.subr.mxu1 %v634_v0 }
 0x105   :  { %586 = vmatpush3.msra.mxu1 %v81_v4 }
 0x106   :  { %587 = vmatprep.subr.mxu1 %v634_v0 }
 0x107   :  { %588 = vmatpush3.msra.mxu1 %v80_v5 }
 0x108   :  { %589 = vmatprep.subr.mxu1 %v634_v0 }
 0x109   :  { %590 = vmatpush3.msra.mxu1 %v79_v6 }
 0x10a   :  { %591 = vmatprep.subr.mxu1 %v634_v0 }
 0x10b   :  { %592 = vmatpush3.msra.mxu1 %v78_v7 }
 0x10c   :  { %593 = vmatprep.subr.mxu1 %v634_v0 }
 0x10d   :  { %594 = vmatpush3.msra.mxu1 %v77_v8 }
 0x10e   :  { %595 = vmatprep.subr.mxu1 %v634_v0 }
 0x10f   :  { %596 = vmatpush3.msra.mxu1 %v76_v15 }
 0x110   :  { %597 = vmatprep.subr.mxu1 %v634_v0 }
 0x111   :  { %598 = vmatpush3.msra.mxu1 %v75_v16 }
 0x112   :  { %599 = vmatprep.subr.mxu1 %v634_v0 }
 0x113   :  { %600 = vmatpush3.msra.mxu1 %v74_v17 }
 0x1b4   :  { %v236_v11 = vpop.f32.mrf.mxu1 }
 0x1b5   :  { %v237_v12 = vadd.f32 %v236_v11, %v169_v10 }
 0x1b6   :  { %v533_v13 = vpop.f32.mrf.mxu1 }
 0x1b7   :  { %v240_v14 = vmax.f32 %v237_v12, 0.0 }
 0x1b9   :  { %567 = vmatmul.mubr.f32.vlgmr.msra.gmra.mxu0 %v240_v14 }
 0x279   :  { %v311_v20 = vpop.f32.mrf.mxu0 }
 0x27a   :  { %v312_v21 = vadd.f32 %v311_v20, %v244_v19 }
 0x27b   :  { %v568_v22 = vpop.f32.mrf.mxu0 }
 0x27c   :  { %v315_v23 = vmax.f32 %v312_v21, 0.0 }
 0x27e   :  { %602 = vmatmul.mubr.f32.vlgmr.msra.gmra.mxu1 %v315_v23 }
 0x33e   :  { %v386_v26 = vpop.f32.mrf.mxu1 }
 0x33f   :  { %v387_v27 = vadd.f32 %v386_v26, %v319_v25 }
 0x340   :  { %v603_v28 = vpop.f32.mrf.mxu1 }
 0x341   :  { %390 = vst [vmem:[%s746_s2] sm:$0xff] %v387_v27 }
 0x342   :  { %395 = vsyncpa [#allocation3], 1 }

</bundles_post_ra>
